<compile_context>
chip_gen: v6e
topology: v6e:2x2x1
jax: 0.10.0
libtpu: 0.0.40
codegen_flags: <defaults>
</compile_context>

<pallas_src>
import functools

import jax
import jax.numpy as jnp
from jax import lax
from jax.experimental import pallas as pl
from jax.experimental.pallas import tpu as pltpu


# ----------------------------- Pallas kernel --------------------------------

def _avg_pool_kernel(x_ref, o_ref, xp_ref, *, ksize, pad, reps):
    # x_ref : (1, C, H, W)          one batch element (unpadded)
    # o_ref : (1, C, Ho, Wo)        pooled output
    # xp_ref: (C, H+2p, W+2p)       VMEM scratch: zero-padded image
    _, C, H, W = x_ref.shape
    Hp, Wp = H + 2 * pad, W + 2 * pad
    Ho, Wo = Hp - ksize + 1, Wp - ksize + 1
    inv = 1.0 / float(ksize * ksize)          # count_include_pad=True -> k*k

    # Build the zero-padded image in VMEM (halo handled in-kernel, no HBM pad).
    xp_ref[...] = jnp.zeros_like(xp_ref)
    xp_ref[:, pad:pad + H, pad:pad + W] = x_ref[0].astype(xp_ref.dtype)

    out = None
    for r in range(reps):
        # Separable box filter.
        # Horizontal pass: 5 lane-shifted loads from the padded scratch.
        h = xp_ref[:, :, 0:Wo]                          # (C, Hp, Wo), f32
        for dx in range(1, ksize):
            h = h + xp_ref[:, :, dx:dx + Wo]
        # Vertical pass: 5 sublane-shifted value slices.
        acc = h[:, 0:Ho, :]                             # (C, Ho, Wo)
        for dy in range(1, ksize):
            acc = acc + h[:, dy:dy + Ho, :]
        out = acc * inv
        if r + 1 < reps:
            # 'same' pooling guaranteed when reps > 1 (Ho==H, Wo==W):
            # feed the result back for the next recursion without leaving VMEM.
            xp_ref[:, pad:pad + H, pad:pad + W] = out

    o_ref[...] = out.reshape(1, C, Ho, Wo).astype(o_ref.dtype)


def _avg_pool2d_pallas(img, *, ksize, pad, reps):
    """reps x AvgPool2d(ksize, stride=1, padding=pad, count_include_pad=True), NCHW."""
    N, C, H, W = img.shape
    Hp, Wp = H + 2 * pad, W + 2 * pad
    Ho, Wo = Hp - ksize + 1, Wp - ksize + 1
    if reps > 1:
        assert (Ho, Wo) == (H, W), "in-kernel recursion fusion needs 'same' pooling"

    kern = functools.partial(_avg_pool_kernel, ksize=ksize, pad=pad, reps=reps)
    return pl.pallas_call(
        kern,
        out_shape=jax.ShapeDtypeStruct((N, C, Ho, Wo), img.dtype),
        grid=(N,),
        in_specs=[pl.BlockSpec((1, C, H, W), lambda n: (n, 0, 0, 0))],
        out_specs=pl.BlockSpec((1, C, Ho, Wo), lambda n: (n, 0, 0, 0)),
        scratch_shapes=[pltpu.VMEM((C, Hp, Wp), jnp.float32)],
        compiler_params=pltpu.CompilerParams(
            dimension_semantics=("parallel",)),
    )(img)


# ------------------------------- wrapper -------------------------------------

def filter_low_forward(img, *, recursions=1, kernel_size=5, stride=1,
                       padding=True, include_pad=True, gaussian=False):
    """Forward pass matching PyTorch FilterLow (default: repeated 5x5 avg pool)."""
    if gaussian:
        # TODO(synk): GaussianFilter branch not implemented (the reference
        # Conv2d(1, 1, ..., groups=3) config is inconsistent); default path only.
        raise NotImplementedError("gaussian=True branch is not implemented")
    if stride != 1 or not include_pad:
        # TODO(synk): only the module's default stride=1 / count_include_pad=True
        # configuration is implemented.
        raise NotImplementedError("only stride=1, count_include_pad=True supported")
    if recursions <= 0:
        return img

    pad = (kernel_size - 1) // 2 if padding else 0
    if 2 * pad == kernel_size - 1:
        # 'same' pooling: fuse every recursion inside one pallas_call.
        return _avg_pool2d_pallas(img, ksize=kernel_size, pad=pad, reps=recursions)
    # padding=False: spatial size shrinks each recursion -> one call per recursion.
    out = img
    for _ in range(recursions):
        out = _avg_pool2d_pallas(out, ksize=kernel_size, pad=pad, reps=1)
    return out


# pure-JAX reference for correctness checks
def _filter_low_ref(img, *, recursions=1, kernel_size=5, padding=True):
    pad = (kernel_size - 1) // 2 if padding else 0
    for _ in range(recursions):
        img = lax.reduce_window(
            img, 0.0, lax.add,
            window_dimensions=(1, 1, kernel_size, kernel_size),
            window_strides=(1, 1, 1, 1),
            padding=((0, 0), (0, 0), (pad, pad), (pad, pad)),
        ) / float(kernel_size * kernel_size)
    return img


# --------------------------------- main --------------------------------------

if __name__ == "__main__":
    key = jax.random.PRNGKey(0)
    N, C, H, W = 2, 3, 16, 16
    img = jax.random.normal(key, (N, C, H, W), jnp.float32)

    # Default FilterLow(): recursions=1, kernel_size=5, padding=True, avg pool.
    out = jax.block_until_ready(filter_low_forward(img))
    assert out.shape == (N, C, H, W)
    want = _filter_low_ref(img)
    assert jnp.allclose(out, want, atol=1e-5, rtol=1e-5)

    # recursions=2 (fused inside a single kernel call).
    out2 = jax.block_until_ready(filter_low_forward(img, recursions=2))
    want2 = _filter_low_ref(img, recursions=2)
    assert jnp.allclose(out2, want2, atol=1e-5, rtol=1e-5)

    # padding=False branch ('valid' pooling, output shrinks).
    out3 = jax.block_until_ready(filter_low_forward(img, padding=False))
    want3 = _filter_low_ref(img, padding=False)
    assert out3.shape == (N, C, H - 4, W - 4)
    assert jnp.allclose(out3, want3, atol=1e-5, rtol=1e-5)

    print("KERNEL_OK")
</pallas_src>

<mosaic_0001>
module attributes {stable_mosaic.version = 11 : i64} {
  func.func @_avg_pool_kernel(%arg0: i32, %arg1: memref<1x3x16x16xf32, #tpu.memory_space<vmem>>, %arg2: memref<1x3x16x16xf32, #tpu.memory_space<vmem>>, %arg3: memref<3x20x20xf32, #tpu.memory_space<vmem>>) attributes {dimension_semantics = [#tpu.dimension_semantics<parallel>], iteration_bounds = array<i64: 2>, scalar_prefetch = 0 : i64, scratch_operands = 1 : i64, tpu.core_type = #tpu.core_type<tc>, window_params = [{transform_indices = @transform_0, window_bounds = array<i64: 1, 3, 16, 16>}, {transform_indices = @transform_1, window_bounds = array<i64: 1, 3, 16, 16>}]} {
    %cst = arith.constant 0.000000e+00 : f32
    %0 = vector.broadcast %cst : f32 to vector<3x20x20xf32>
    %c0 = arith.constant 0 : index
    %c0_0 = arith.constant 0 : index
    %c0_1 = arith.constant 0 : index
    %1 = vector.load %arg3[%c0, %c0_0, %c0_1] : memref<3x20x20xf32, #tpu.memory_space<vmem>>, vector<3x20x20xf32>
    tpu.vector_store %arg3[%c0, %c0_0, %c0_1], %0 {strides = array<i32>} : memref<3x20x20xf32, #tpu.memory_space<vmem>>, vector<3x20x20xf32>,
    %c0_2 = arith.constant 0 : index
    %c0_3 = arith.constant 0 : index
    %c0_4 = arith.constant 0 : index
    %c0_5 = arith.constant 0 : index
    %2 = vector.load %arg1[%c0_2, %c0_3, %c0_4, %c0_5] : memref<1x3x16x16xf32, #tpu.memory_space<vmem>>, vector<1x3x16x16xf32>
    %3 = vector.shape_cast %2 : vector<1x3x16x16xf32> to vector<3x16x16xf32>
    %c0_6 = arith.constant 0 : index
    %c2 = arith.constant 2 : index
    %c2_7 = arith.constant 2 : index
    %4 = vector.load %arg3[%c0_6, %c2, %c2_7] : memref<3x20x20xf32, #tpu.memory_space<vmem>>, vector<3x16x16xf32>
    tpu.vector_store %arg3[%c0_6, %c2, %c2_7], %3 {strides = array<i32>} : memref<3x20x20xf32, #tpu.memory_space<vmem>>, vector<3x16x16xf32>,
    %c0_8 = arith.constant 0 : index
    %c0_9 = arith.constant 0 : index
    %c0_10 = arith.constant 0 : index
    %5 = vector.load %arg3[%c0_8, %c0_9, %c0_10] : memref<3x20x20xf32, #tpu.memory_space<vmem>>, vector<3x20x16xf32>
    %c0_11 = arith.constant 0 : index
    %c0_12 = arith.constant 0 : index
    %c1 = arith.constant 1 : index
    %6 = vector.load %arg3[%c0_11, %c0_12, %c1] : memref<3x20x20xf32, #tpu.memory_space<vmem>>, vector<3x20x16xf32>
    %7 = arith.addf %5, %6 : vector<3x20x16xf32>
    %c0_13 = arith.constant 0 : index
    %c0_14 = arith.constant 0 : index
    %c2_15 = arith.constant 2 : index
    %8 = vector.load %arg3[%c0_13, %c0_14, %c2_15] : memref<3x20x20xf32, #tpu.memory_space<vmem>>, vector<3x20x16xf32>
    %9 = arith.addf %7, %8 : vector<3x20x16xf32>
    %c0_16 = arith.constant 0 : index
    %c0_17 = arith.constant 0 : index
    %c3 = arith.constant 3 : index
    %10 = vector.load %arg3[%c0_16, %c0_17, %c3] : memref<3x20x20xf32, #tpu.memory_space<vmem>>, vector<3x20x16xf32>
    %11 = arith.addf %9, %10 : vector<3x20x16xf32>
    %c0_18 = arith.constant 0 : index
    %c0_19 = arith.constant 0 : index
    %c4 = arith.constant 4 : index
    %12 = vector.load %arg3[%c0_18, %c0_19, %c4] : memref<3x20x20xf32, #tpu.memory_space<vmem>>, vector<3x20x16xf32>
    %13 = arith.addf %11, %12 : vector<3x20x16xf32>
    %14 = vector.extract_strided_slice %13 {offsets = [0, 0, 0], sizes = [3, 16, 16], strides = [1, 1, 1]} : vector<3x20x16xf32> to vector<3x16x16xf32>
    %15 = vector.extract_strided_slice %13 {offsets = [0, 1, 0], sizes = [3, 16, 16], strides = [1, 1, 1]} : vector<3x20x16xf32> to vector<3x16x16xf32>
    %16 = arith.addf %14, %15 : vector<3x16x16xf32>
    %17 = vector.extract_strided_slice %13 {offsets = [0, 2, 0], sizes = [3, 16, 16], strides = [1, 1, 1]} : vector<3x20x16xf32> to vector<3x16x16xf32>
    %18 = arith.addf %16, %17 : vector<3x16x16xf32>
    %19 = vector.extract_strided_slice %13 {offsets = [0, 3, 0], sizes = [3, 16, 16], strides = [1, 1, 1]} : vector<3x20x16xf32> to vector<3x16x16xf32>
    %20 = arith.addf %18, %19 : vector<3x16x16xf32>
    %21 = vector.extract_strided_slice %13 {offsets = [0, 4, 0], sizes = [3, 16, 16], strides = [1, 1, 1]} : vector<3x20x16xf32> to vector<3x16x16xf32>
    %22 = arith.addf %20, %21 : vector<3x16x16xf32>
    %cst_20 = arith.constant 4.000000e-02 : f32
    %23 = vector.broadcast %cst_20 : f32 to vector<3x16x16xf32>
    %24 = arith.mulf %22, %23 : vector<3x16x16xf32>
    %25 = vector.shape_cast %24 : vector<3x16x16xf32> to vector<1x3x16x16xf32>
    %c0_21 = arith.constant 0 : index
    %c0_22 = arith.constant 0 : index
    %c0_23 = arith.constant 0 : index
    %c0_24 = arith.constant 0 : index
    %26 = vector.load %arg2[%c0_21, %c0_22, %c0_23, %c0_24] : memref<1x3x16x16xf32, #tpu.memory_space<vmem>>, vector<1x3x16x16xf32>
    tpu.vector_store %arg2[%c0_21, %c0_22, %c0_23, %c0_24], %25 {strides = array<i32>} : memref<1x3x16x16xf32, #tpu.memory_space<vmem>>, vector<1x3x16x16xf32>,
    return
  }
  func.func @transform_0(%arg0: i32) -> (i32, i32, i32, i32) {
    %c0_i32 = arith.constant 0 : i32
    %c0_i32_0 = arith.constant 0 : i32
    %c0_i32_1 = arith.constant 0 : i32
    %c0_i32_2 = arith.constant 0 : i32
    return %arg0, %c0_i32, %c0_i32_0, %c0_i32_1 : i32, i32, i32, i32
  }
  func.func @transform_1(%arg0: i32) -> (i32, i32, i32, i32) {
    %c0_i32 = arith.constant 0 : i32
    %c0_i32_0 = arith.constant 0 : i32
    %c0_i32_1 = arith.constant 0 : i32
    %c0_i32_2 = arith.constant 0 : i32
    return %arg0, %c0_i32, %c0_i32_0, %c0_i32_1 : i32, i32, i32, i32
  }
}

</mosaic_0001>

<bundles_post_ra>
// kernel: tpu_custom_call.1
= control target key start
LH: loop header
LB: loop body
LE: loop exit
PB: predicated region body
PF: predicated region fallthrough
CT: control target
= control target key end

     0   :  { %6 = vsyncpa [#allocation4], 0  ;;  %s1011_s0 = inlined_call_operand.hbm [shape: f32[2,3,16,16], index: 0, kind: input, shape index: {}]   ;;  %s1012_s1 = inlined_call_operand.hbm [shape: f32[2,3,16,16], index: 1, kind: output, shape index: {}]  }
   0x1   :  { %8 = vsyncpa [#allocation4 + $0x1], 0 }
   0x2   :  { %9 = vsyncpa [#allocation5], 0 }
   0x3   :  { %11 = vsyncpa [#allocation5 + $0x1], 0  ;;  %s750_s6 = smov 0   ;;  %s752_s7 = smov 0  }
   0x4   :  { %s754_s8 = smov 0   ;;  %s756_s9 = smov 0  }
   0x5 LB: > { %s771_s10 = sadd.s32 4294967295, %s726_s9   ;;  %s566_s11 = sadd.s32 4294967294, %s726_s9   ;;  %s726_s9 = sphi %s756_s9, %s1026_s9   ;;  %s722_s8 = sphi %s754_s8, %s1025_s8   ;;  %s718_s7 = sphi %s752_s7, %s1024_s7   ;;  %s714_s6 = sphi %s750_s6, %s1023_s6  }
   0x6   : > { %s775_s12 = sadd.s32 1, %s726_s9   ;;  %s24_s13 = sadd.s32 1, %s722_s8 }
   0x7   : > { %s21_s14 = ssub.s32 %s726_s9, %s775_s12  ;;  %p31_p0 = scmp.ne.s32.totalorder %s722_s8, %s718_s7 }
   0x8   : > { %p22_p1 = scmp.eq.s32.totalorder %s21_s14, 0  ;;  %p32_p2 = scmp.eq.s32.totalorder %s726_s9, 0 }
   0x9   : > { %p37_p3 = scmp.ne.s32.totalorder %s718_s7, %s714_s6  ;;  %p38_p4 = scmp.eq.s32.totalorder %s771_s10, 0 }
   0xa   : > { %s787_s15 = scalar_select %p22_p1, %s722_s8, %s24_s13  }
   0xb   : > { %p33_p5 = por %p32_p2, %p31_p0  ;;  %p789_p6 = por %p38_p4, %p37_p3 }
   0xc   : > { %p61_p7 = scmp.eq.s32.totalorder %s771_s10, 1  ;;  %p67_p8 = scmp.eq.s32.totalorder %s566_s11, 1 }
   0xd   : > { %s1015_s16 = scalar_select %p789_p6, 1, 0 }
   0xe   : > { %p590_p10 = scmp.lt.s32.totalorder %s726_s9, 2  ;;  %p796_p11 = por %p61_p7, %p31_p0 }
   0xf   : > { %p800_p12 = por %p67_p8, %p37_p3  ;;  %s87_s19 = sand.u32 1, %s722_s8  }
  0x10   : > { %s1016_s17 = scalar_select %p796_p11, 1, 0 }
  0x11   : > { %s1017_s18 = scalar_select %p800_p12, 1, 0 }
  0x12   : > { %s575_s20 = smul.u32 768, %s726_s9  ;;  %p811_p13 = pnand %p590_p10, %p33_p5 }
  0x13   : > { %s574_s21 = smul.u32 48, %s87_s19  ;;  %s817_s28 = scalar_lea.sflag [#allocation4], %s87_s19 }
  0x14   : > { %s809_s24 = scalar_lea.hbm %s1011_s0, %s575_s20  ;;  %p636_p1 = pneg %p811_p13 }
  0x15   : > { %s91_s26 = scalar_lea.vmem [#allocation3], %s574_s21  ;;  %s634_s29 = scalar_lea.hbm %s809_s24, 768 }
  0x16   : > { %s98_s27 = sshll.u32 %s91_s26, 4  ;;  %p635_p0 = scmp.ne.s32.totalorder %s809_s24, %s634_s29  ;;  %s815_s27 = int_to_ptr.vmem [resolvable:$true] %s98_s27 }
  0x17   : > { %s639_s3 = scalar_lea.hbm %s1011_s0, 1536  ;;  %p640_p4 = scmp.lt.s32.totalorder %s809_s24, %s1011_s0 }
  0x18   : > { %p637_p2 = pnand %p636_p1, %p635_p0  ;;  %p641_p5 = scmp.lt.s32.totalorder %s639_s3, %s634_s29 }
  0x1a   : > { %p638_p3 = pneg %p637_p2  ;;  %p642_p7 = por %p641_p5, %p640_p4 }
  0x1c   : > { %p643_p8 = pnand %p642_p7, %p638_p3 }
  0x1e   : > { %646 = shalt.err (!%p643_p8)
}
  0x1f   : > { %s647_s11 = scalar_lea.vmem %s815_s27, 768  ;;  %s728_s13 = smov [#allocation3]  }
  0x20   : > { %p648_p10 = scmp.ne.s32.totalorder %s815_s27, %s647_s11  ;;  %s652_s14 = sshll.u32 %s728_s13, 4  ;;  %s653_s14 = int_to_ptr.vmem [resolvable:$false] %s652_s14 }
  0x21   : > { %s654_s19 = scalar_lea.vmem %s653_s14, 1536  ;;  %p655_p2 = scmp.lt.s32.totalorder %s815_s27, %s653_s14 }
  0x22   : > { %p650_p9 = pnand %p648_p10, %p636_p1  ;;  %p656_p12 = scmp.lt.s32.totalorder %s654_s19, %s647_s11 }
  0x24   : > { %p651_p0 = pneg %p650_p9  ;;  %p657_p11 = por %p656_p12, %p655_p2 }
  0x26   : > { %p658_p6 = pnand %p657_p11, %p651_p0 }
  0x28   : > { %661 = shalt.err (!%p658_p6)
}
  0x29   : > { %s729_s20 = smov 128   ;;  %s730_s21 = smov 8  }
  0x2a   : > { %585 = dma.hbm_to_vmem [thread:$0]  (!%p811_p13), %s809_s24, 768, %s815_s27, %s817_s28, %s729_s20, %s729_s20, %s730_s21  }
  0x2b   : > { %p570_p9 = scmp.ge.s32.totalorder %s726_s9, 1  ;;  %p106_p1 = scmp.lt.s32.totalorder %s726_s9, 3 }
  0x2d   : > { %p107_p3 = pnand %p570_p9, %p106_p1 }
  0x2e   : > { %s841_s22 = sand.u32 (!%p107_p3), 1, %s718_s7   ;;  %p1019_p6 = scmp.ne.s32.totalorder (!%p107_p3), %s1015_s16, 0 }
  0x2f   : > { %110 = sbr.rel (%p107_p3) target bundleno = 396 (0x18c), region = 24  ;;  %s113_s26 = scalar_lea.sflag (!%p107_p3), [#allocation4], %s841_s22 }
  0x30   : > { %s576_s23 = smul.u32 (!%p107_p3), 48, %s841_s22 }
  0x32   : > { %s116_s29 = scalar_lea.vmem (!%p107_p3), [#allocation3], %s576_s23 }
  0x34   : > { %705 = dma.done.wait (%p1019_p6), %s113_s26, 768  }
  0x35   : > { %707 = vsyncadd (%p1019_p6), %s113_s26, 4294966528  ;;  %vm135_vm0 = vcmask 162816   ;;  %vm138_vm1 = vcmask 158720   ;;  %v731_v0 = vmov 0.0   ;;  %v146_v1 = vld [vmem:[%s116_s29] sm:$0xff]  ;;  %v148_v2 = vld [vmem:[%s116_s29 + $0x10] sm:$0xff] }
  0x36   : > { %136 = vst.msk [vmem:[#allocation2] sm:$0xff] %vm135_vm0, %v731_v0  ;;  %137 = vst.msk [vmem:[#allocation2 + $0x8] sm:$0xff] %vm135_vm0, %v731_v0  ;;  %s732_s24 = smov 2   ;;  %v147_v3 = vld [vmem:[%s116_s29 + $0x8] sm:$0xff]  ;;  %v149_v4 = vld [vmem:[%s116_s29 + $0x18] sm:$0xff]  ;;  %vm176_vm2 = vcmask 146448  }
  0x37   : > { %140 = vst.msk [vmem:[#allocation2 + $0x18] sm:$0xff] %vm135_vm0, %v731_v0  ;;  %141 = vst.msk [vmem:[#allocation2 + $0x20] sm:$0xff] %vm135_vm0, %v731_v0  ;;  %158 = vrot.lane.b32.xlu0 %v146_v1, %s732_s24  ;;  %162 = vrot.lane.b32.xlu1 %v148_v2, %s732_s24  ;;  %v150_v5 = vld [vmem:[%s116_s29 + $0x20] sm:$0xff]  ;;  %v151_v6 = vld [vmem:[%s116_s29 + $0x28] sm:$0xff]  ;;  %s733_s16 = smov 127   ;;  %s734_s25 = smov 126  }
  0x38   : > { %143 = vst.msk [vmem:[#allocation2 + $0x30] sm:$0xff] %vm135_vm0, %v731_v0  ;;  %144 = vst.msk [vmem:[#allocation2 + $0x38] sm:$0xff] %vm135_vm0, %v731_v0  ;;  %s735_s27 = smov 125   ;;  %s736_s28 = smov 124   ;;  %vm354_vm3 = vcmask 1046528   ;;  %vm382_vm4 = vcmask 1045504  }
  0x39   : > { %139 = vst.msk [vmem:[#allocation2 + $0x10] sm:$0xf] %vm138_vm1, %v731_v0  ;;  %142 = vst.msk [vmem:[#allocation2 + $0x28] sm:$0xf] %vm138_vm1, %v731_v0  ;;  %vm410_vm5 = vcmask 1044480   ;;  %vm438_vm6 = vcmask 1043456  }
  0x3a   : > { %145 = vst.msk [vmem:[#allocation2 + $0x40] sm:$0xf] %vm138_vm1, %v731_v0  ;;  %vm472_vm7 = vcmask 130048   ;;  %s935_s30 = scalar_lea.vmem [#allocation6], %s576_s23  ;;  %s577_s2 = smul.u32 768, %s771_s10 }
  0x3b   : > { %160 = vrot.lane.b32.xlu0 %v147_v3, %s732_s24  ;;  %164 = vrot.lane.b32.xlu1 %v149_v4, %s732_s24  ;;  %s493_s3 = sshll.u32 %s935_s30, 4  ;;  %s480_s10 = scalar_lea.sflag [#allocation5], %s841_s22  ;;  %s966_s3 = int_to_ptr.vmem [resolvable:$true] %s493_s3 }
  0x3c   : > { %s962_s11 = scalar_lea.hbm %s1012_s1, %s577_s2  ;;  %s662_s13 = scalar_lea.vmem %s966_s3, 768 }
  0x3d   : > { %p663_p11 = scmp.ne.s32.totalorder %s966_s3, %s662_s13  ;;  %p1020_p12 = scmp.ne.s32.totalorder %s1016_s17, 0 }
  0x3e   : > { %s737_s14 = smov [#allocation6]  }
  0x3f   : > { %166 = vrot.lane.b32.xlu0 %v150_v5, %s732_s24  ;;  %168 = vrot.lane.b32.xlu1 %v151_v6, %s732_s24  ;;  %p664_p13 = pnand %p663_p11, %p1020_p12  ;;  %s666_s19 = sshll.u32 %s737_s14, 4  ;;  %s667_s19 = int_to_ptr.vmem [resolvable:$false] %s666_s19 }
  0x40   : > { %s668_s20 = scalar_lea.vmem %s667_s19, 1536  ;;  %p669_p5 = scmp.lt.s32.totalorder %s966_s3, %s667_s19 }
  0x41   : > { %p665_p4 = pneg %p664_p13  ;;  %p670_p7 = scmp.lt.s32.totalorder %s668_s20, %s662_s13 }
  0x43   : > { %p671_p8 = por %p670_p7, %p669_p5 }
  0x45   : > { %p672_p10 = pnand %p671_p8, %p665_p4 }
  0xa9   : > { %v159_v7 = vpop.permute.xlu0 %158  ;;  %v163_v8 = vpop.permute.xlu1 %162 }
  0xaa   : > { %177 = vst.msk [vmem:[#allocation2 + $0x2] sm:$0xff] %vm176_vm2, %v159_v7  ;;  %179 = vst.msk [vmem:[#allocation2 + $0x1a] sm:$0xff] %vm176_vm2, %v163_v8 }
  0xad   : > { %v161_v9 = vpop.permute.xlu0 %160  ;;  %v165_v10 = vpop.permute.xlu1 %164 }
  0xae   : > { %178 = vst.msk [vmem:[#allocation2 + $0xa] sm:$0xff] %vm176_vm2, %v161_v9  ;;  %180 = vst.msk [vmem:[#allocation2 + $0x22] sm:$0xff] %vm176_vm2, %v165_v10 }
  0xb1   : > { %v851_v11 = vld [vmem:[#allocation2] sm:$0xff]  ;;  %v167_v12 = vpop.permute.xlu0 %166  ;;  %v169_v13 = vpop.permute.xlu1 %168  ;;  %v860_v16 = vld [vmem:[#allocation2 + $0x18] sm:$0xff] }
  0xb2   : > { %201 = vrot.lane.b32.xlu0 %v851_v11, %s733_s16  ;;  %181 = vst.msk [vmem:[#allocation2 + $0x32] sm:$0xff] %vm176_vm2, %v167_v12  ;;  %182 = vst.msk [vmem:[#allocation2 + $0x3a] sm:$0xff] %vm176_vm2, %v169_v13 }
  0xb5   : > { %v854_v14 = vld [vmem:[#allocation2 + $0x8] sm:$0xff]  ;;  %v856_v15 = vld [vmem:[#allocation2 + $0x10] sm:$0xf]  ;;  %v862_v17 = vld [vmem:[#allocation2 + $0x20] sm:$0xff] }
  0xb6   : > { %203 = vrot.lane.b32.xlu1 %v854_v14, %s733_s16  ;;  %205 = vrot.lane.b32.xlu0 %v856_v15, %s733_s16  ;;  %v866_v18 = vld [vmem:[#allocation2 + $0x28] sm:$0xf] }
  0xb9   : > { %v868_v19 = vld [vmem:[#allocation2 + $0x30] sm:$0xff]  ;;  %v872_v20 = vld [vmem:[#allocation2 + $0x38] sm:$0xff]  ;;  %v874_v21 = vld [vmem:[#allocation2 + $0x40] sm:$0xf] }
  0xba   : > { %207 = vrot.lane.b32.xlu1 %v860_v16, %s733_s16  ;;  %209 = vrot.lane.b32.xlu0 %v862_v17, %s733_s16 }
  0xbe   : > { %211 = vrot.lane.b32.xlu1 %v866_v18, %s733_s16  ;;  %213 = vrot.lane.b32.xlu0 %v868_v19, %s733_s16 }
  0xc2   : > { %215 = vrot.lane.b32.xlu1 %v872_v20, %s733_s16  ;;  %217 = vrot.lane.b32.xlu0 %v874_v21, %s733_s16 }
  0xc6   : > { %237 = vrot.lane.b32.xlu1 %v851_v11, %s734_s25  ;;  %239 = vrot.lane.b32.xlu0 %v854_v14, %s734_s25 }
  0xca   : > { %241 = vrot.lane.b32.xlu1 %v856_v15, %s734_s25  ;;  %243 = vrot.lane.b32.xlu0 %v860_v16, %s734_s25 }
  0xce   : > { %245 = vrot.lane.b32.xlu1 %v862_v17, %s734_s25  ;;  %247 = vrot.lane.b32.xlu0 %v866_v18, %s734_s25 }
  0xd2   : > { %249 = vrot.lane.b32.xlu1 %v868_v19, %s734_s25  ;;  %251 = vrot.lane.b32.xlu0 %v872_v20, %s734_s25 }
  0xd6   : > { %253 = vrot.lane.b32.xlu1 %v874_v21, %s734_s25  ;;  %273 = vrot.lane.b32.xlu0 %v851_v11, %s735_s27 }
  0xda   : > { %275 = vrot.lane.b32.xlu1 %v854_v14, %s735_s27  ;;  %277 = vrot.lane.b32.xlu0 %v856_v15, %s735_s27 }
  0xde   : > { %279 = vrot.lane.b32.xlu1 %v860_v16, %s735_s27  ;;  %281 = vrot.lane.b32.xlu0 %v862_v17, %s735_s27 }
  0xe2   : > { %283 = vrot.lane.b32.xlu1 %v866_v18, %s735_s27  ;;  %285 = vrot.lane.b32.xlu0 %v868_v19, %s735_s27 }
  0xe6   : > { %287 = vrot.lane.b32.xlu1 %v872_v20, %s735_s27  ;;  %289 = vrot.lane.b32.xlu0 %v874_v21, %s735_s27 }
  0xea   : > { %309 = vrot.lane.b32.xlu1 %v851_v11, %s736_s28  ;;  %311 = vrot.lane.b32.xlu0 %v854_v14, %s736_s28 }
  0xee   : > { %313 = vrot.lane.b32.xlu1 %v856_v15, %s736_s28  ;;  %315 = vrot.lane.b32.xlu0 %v860_v16, %s736_s28 }
  0xf2   : > { %317 = vrot.lane.b32.xlu1 %v862_v17, %s736_s28  ;;  %319 = vrot.lane.b32.xlu0 %v866_v18, %s736_s28 }
  0xf6   : > { %321 = vrot.lane.b32.xlu1 %v868_v19, %s736_s28  ;;  %323 = vrot.lane.b32.xlu0 %v872_v20, %s736_s28 }
  0xfa   : > { %325 = vrot.lane.b32.xlu1 %v874_v21, %s736_s28 }
 0x124   : > { %v202_v22 = vpop.permute.xlu0 %201 }
 0x125   : > { %v228_v47 = vadd.f32 %v202_v22, %v851_v11 }
 0x128   : > { %v204_v23 = vpop.permute.xlu1 %203  ;;  %v206_v24 = vpop.permute.xlu0 %205 }
 0x129   : > { %v229_v48 = vadd.f32 %v204_v23, %v854_v14  ;;  %v230_v53 = vadd.f32 %v206_v24, %v856_v15 }
 0x12c   : > { %v208_v25 = vpop.permute.xlu1 %207  ;;  %v210_v26 = vpop.permute.xlu0 %209 }
 0x12d   : > { %v231_v54 = vadd.f32 %v208_v25, %v860_v16  ;;  %v232_v55 = vadd.f32 %v210_v26, %v862_v17 }
 0x130   : > { %v212_v27 = vpop.permute.xlu1 %211  ;;  %v214_v28 = vpop.permute.xlu0 %213 }
 0x131   : > { %v233_v56 = vadd.f32 %v212_v27, %v866_v18  ;;  %v234_v57 = vadd.f32 %v214_v28, %v868_v19 }
 0x134   : > { %v216_v29 = vpop.permute.xlu1 %215  ;;  %v218_v30 = vpop.permute.xlu0 %217 }
 0x135   : > { %v235_v60 = vadd.f32 %v216_v29, %v872_v20  ;;  %v236_v61 = vadd.f32 %v218_v30, %v874_v21 }
 0x138   : > { %v238_v31 = vpop.permute.xlu1 %237  ;;  %v240_v32 = vpop.permute.xlu0 %239 }
 0x139   : > { %v264_v51 = vadd.f32 %v238_v31, %v228_v47  ;;  %v265_v52 = vadd.f32 %v240_v32, %v229_v48 }
 0x13c   : > { %v242_v33 = vpop.permute.xlu1 %241  ;;  %v244_v34 = vpop.permute.xlu0 %243 }
 0x13d   : > { %v266_v62 = vadd.f32 %v242_v33, %v230_v53  ;;  %v267_v63 = vadd.f32 %v244_v34, %v231_v54 }
 0x140   : > { %v246_v35 = vpop.permute.xlu1 %245  ;;  %v248_v36 = vpop.permute.xlu0 %247 }
 0x141   : > { %v268_v2 = vadd.f32 %v246_v35, %v232_v55  ;;  %v269_v3 = vadd.f32 %v248_v36, %v233_v56 }
 0x144   : > { %v250_v37 = vpop.permute.xlu1 %249  ;;  %v252_v38 = vpop.permute.xlu0 %251 }
 0x145   : > { %v270_v6 = vadd.f32 %v250_v37, %v234_v57  ;;  %v271_v7 = vadd.f32 %v252_v38, %v235_v60 }
 0x148   : > { %v254_v39 = vpop.permute.xlu1 %253  ;;  %v274_v40 = vpop.permute.xlu0 %273 }
 0x149   : > { %v300_v58 = vadd.f32 %v274_v40, %v264_v51  ;;  %v272_v8 = vadd.f32 %v254_v39, %v236_v61 }
 0x14c   : > { %v276_v41 = vpop.permute.xlu1 %275  ;;  %v278_v42 = vpop.permute.xlu0 %277 }
 0x14d   : > { %v301_v59 = vadd.f32 %v276_v41, %v265_v52  ;;  %v302_v9 = vadd.f32 %v278_v42, %v266_v62 }
 0x150   : > { %v280_v43 = vpop.permute.xlu1 %279  ;;  %v282_v44 = vpop.permute.xlu0 %281 }
 0x151   : > { %v303_v10 = vadd.f32 %v280_v43, %v267_v63  ;;  %v304_v11 = vadd.f32 %v282_v44, %v268_v2 }
 0x154   : > { %v284_v45 = vpop.permute.xlu1 %283  ;;  %v286_v46 = vpop.permute.xlu0 %285 }
 0x155   : > { %v305_v24 = vadd.f32 %v284_v45, %v269_v3  ;;  %v306_v25 = vadd.f32 %v286_v46, %v270_v6 }
 0x158   : > { %v288_v49 = vpop.permute.xlu1 %287  ;;  %v290_v50 = vpop.permute.xlu0 %289 }
 0x159   : > { %v307_v26 = vadd.f32 %v288_v49, %v271_v7  ;;  %v308_v32 = vadd.f32 %v290_v50, %v272_v8 }
 0x15c   : > { %v310_v0 = vpop.permute.xlu1 %309  ;;  %v312_v1 = vpop.permute.xlu0 %311 }
 0x15d   : > { %v336_v4 = vadd.f32 %v310_v0, %v300_v58  ;;  %v337_v5 = vadd.f32 %v312_v1, %v301_v59 }
 0x15f   : > { %v355_v12 = vrot.slane %v336_v4, 1  ;;  %v383_v13 = vrot.slane %v336_v4, 2  ;;  %v411_v14 = vrot.slane %v336_v4, 3  ;;  %v356_v15 = vrot.slane %v337_v5, 1 }
 0x160   : > { %v384_v16 = vrot.slane %v337_v5, 2  ;;  %v412_v17 = vrot.slane %v337_v5, 3  ;;  %v314_v18 = vpop.permute.xlu1 %313  ;;  %v316_v19 = vpop.permute.xlu0 %315  ;;  %v439_v20 = vrot.slane %v336_v4, 4  ;;  %v440_v21 = vrot.slane %v337_v5, 4 }
 0x161   : > { %v338_v22 = vadd.f32 %v314_v18, %v302_v9  ;;  %v914_v23 = vadd.f32 %v316_v19, %v303_v10  ;;  %v357_v27 = vsel %vm354_vm3, %v355_v12, %v356_v15 }
 0x162   : > { %v376_v28 = vadd.f32 %v357_v27, %v336_v4  ;;  %v385_v33 = vsel %vm382_vm4, %v383_v13, %v384_v16  ;;  %v413_v34 = vsel %vm410_vm5, %v411_v14, %v412_v17  ;;  %v441_v39 = vsel %vm438_vm6, %v439_v20, %v440_v21 }
 0x163   : > { %v358_v29 = vrot.slane %v338_v22, 1  ;;  %v386_v30 = vrot.slane %v338_v22, 2  ;;  %v414_v31 = vrot.slane %v338_v22, 3  ;;  %v442_v35 = vrot.slane %v338_v22, 4 }
 0x164   : > { %v318_v36 = vpop.permute.xlu1 %317  ;;  %v320_v37 = vpop.permute.xlu0 %319  ;;  %v404_v38 = vadd.f32 %v385_v33, %v376_v28  ;;  %v360_v41 = vrot.slane %v914_v23, 1  ;;  %v388_v43 = vrot.slane %v914_v23, 2  ;;  %v416_v44 = vrot.slane %v914_v23, 3 }
 0x165   : > { %v359_v40 = vsel %vm354_vm3, %v356_v15, %v358_v29  ;;  %v340_v45 = vadd.f32 %v318_v36, %v304_v11  ;;  %v387_v47 = vsel %vm382_vm4, %v384_v16, %v386_v30  ;;  %v415_v48 = vsel %vm410_vm5, %v412_v17, %v414_v31 }
 0x166   : > { %v377_v42 = vadd.f32 %v359_v40, %v337_v5  ;;  %v432_v46 = vadd.f32 %v413_v34, %v404_v38  ;;  %v341_v49 = vadd.f32 %v320_v37, %v305_v24  ;;  %v443_v51 = vsel %vm438_vm6, %v440_v21, %v442_v35 }
 0x167   : > { %v361_v52 = vrot.slane %v340_v45, 1  ;;  %v389_v53 = vrot.slane %v340_v45, 2  ;;  %v444_v56 = vrot.slane %v914_v23, 4  ;;  %v417_v61 = vrot.slane %v340_v45, 3 }
 0x168   : > { %v405_v50 = vadd.f32 %v387_v47, %v377_v42  ;;  %v322_v54 = vpop.permute.xlu1 %321  ;;  %v460_v55 = vadd.f32 %v441_v39, %v432_v46  ;;  %v363_v57 = vrot.slane %v341_v49, 1  ;;  %v391_v58 = vrot.slane %v341_v49, 2  ;;  %v324_v63 = vpop.permute.xlu0 %323 }
 0x169   : > { %v362_v60 = vsel %vm354_vm3, %v360_v41, %v361_v52  ;;  %v445_v62 = vrot.slane %v340_v45, 4  ;;  %v390_v2 = vsel %vm382_vm4, %v388_v43, %v389_v53  ;;  %v419_v7 = vrot.slane %v341_v49, 3 }
 0x16a   : > { %v433_v59 = vadd.f32 %v415_v48, %v405_v50  ;;  %v466_v0 = vmul.f32 0.04, %v460_v55  ;;  %v378_v1 = vadd.f32 %v362_v60, %v914_v23  ;;  %v364_v3 = vsel %vm354_vm3, %v361_v52, %v363_v57 }
 0x16b   : > { %v379_v5 = vadd.f32 %v364_v3, %v340_v45  ;;  %v392_v6 = vsel %vm382_vm4, %v389_v53, %v391_v58  ;;  %v447_v10 = vrot.slane %v341_v49, 4  ;;  %v342_v11 = vadd.f32 %v322_v54, %v306_v25 }
 0x16c   : > { %v461_v4 = vadd.f32 %v443_v51, %v433_v59  ;;  %v326_v8 = vpop.permute.xlu1 %325  ;;  %473 = vst.msk [vmem:[%s935_s30] sm:$0xff] %vm472_vm7, %v466_v0  ;;  %v406_v9 = vadd.f32 %v390_v2, %v378_v1  ;;  %v343_v12 = vadd.f32 %v324_v63, %v307_v26  ;;  %v418_v14 = vsel %vm410_vm5, %v416_v44, %v417_v61 }
 0x16d   : > { %v407_v15 = vadd.f32 %v392_v6, %v379_v5  ;;  %v344_v16 = vadd.f32 %v326_v8, %v308_v32  ;;  %v446_v18 = vsel %vm438_vm6, %v444_v56, %v445_v62  ;;  %v420_v19 = vsel %vm410_vm5, %v417_v61, %v419_v7 }
 0x16e   : > { %v467_v13 = vmul.f32 0.04, %v461_v4  ;;  %v434_v17 = vadd.f32 %v418_v14, %v406_v9  ;;  %v365_v20 = vrot.slane %v342_v11, 1  ;;  %v448_v22 = vsel %vm438_vm6, %v445_v62, %v447_v10 }
 0x16f   : > { %v435_v21 = vadd.f32 %v420_v19, %v407_v15  ;;  %v393_v23 = vrot.slane %v342_v11, 2  ;;  %v366_v24 = vrot.slane %v343_v12, 1  ;;  %v421_v26 = vrot.slane %v342_v11, 3 }
 0x170   : > { %474 = vst.msk [vmem:[%s935_s30 + $0x8] sm:$0xff] %vm472_vm7, %v467_v13  ;;  %v462_v25 = vadd.f32 %v446_v18, %v434_v17  ;;  %v394_v27 = vrot.slane %v343_v12, 2  ;;  %v422_v28 = vrot.slane %v343_v12, 3  ;;  %v368_v31 = vrot.slane %v344_v16, 1 }
 0x171   : > { %v463_v29 = vadd.f32 %v448_v22, %v435_v21  ;;  %v367_v30 = vsel %vm354_vm3, %v365_v20, %v366_v24  ;;  %v396_v32 = vrot.slane %v344_v16, 2  ;;  %v449_v34 = vrot.slane %v342_v11, 4 }
 0x172   : > { %v468_v33 = vmul.f32 0.04, %v462_v25  ;;  %v380_v35 = vadd.f32 %v367_v30, %v342_v11  ;;  %v395_v37 = vsel %vm382_vm4, %v393_v23, %v394_v27  ;;  %v450_v38 = vrot.slane %v343_v12, 4 }
 0x173   : > { %v469_v36 = vmul.f32 0.04, %v463_v29  ;;  %v369_v39 = vsel %vm354_vm3, %v366_v24, %v368_v31  ;;  %v424_v42 = vrot.slane %v344_v16, 3  ;;  %v423_v43 = vsel %vm410_vm5, %v421_v26, %v422_v28 }
 0x174   : > { %475 = vst.msk [vmem:[%s935_s30 + $0x10] sm:$0xff] %vm472_vm7, %v468_v33  ;;  %v408_v40 = vadd.f32 %v395_v37, %v380_v35  ;;  %v381_v41 = vadd.f32 %v369_v39, %v343_v12  ;;  %v397_v44 = vsel %vm382_vm4, %v394_v27, %v396_v32  ;;  %v452_v45 = vrot.slane %v344_v16, 4 }
 0x175   : > { %476 = vst.msk [vmem:[%s935_s30 + $0x18] sm:$0xff] %vm472_vm7, %v469_v36  ;;  %v451_v48 = vsel %vm438_vm6, %v449_v34, %v450_v38  ;;  %v425_v49 = vsel %vm410_vm5, %v422_v28, %v424_v42 }
 0x176   : > { %v436_v46 = vadd.f32 %v423_v43, %v408_v40  ;;  %v409_v47 = vadd.f32 %v397_v44, %v381_v41  ;;  %v453_v52 = vsel %vm438_vm6, %v450_v38, %v452_v45 }
 0x178   : > { %v464_v50 = vadd.f32 %v451_v48, %v436_v46  ;;  %v437_v51 = vadd.f32 %v425_v49, %v409_v47 }
 0x17a   : > { %v470_v53 = vmul.f32 0.04, %v464_v50  ;;  %v465_v54 = vadd.f32 %v453_v52, %v437_v51 }
 0x17c   : > { %477 = vst.msk [vmem:[%s935_s30 + $0x20] sm:$0xff] %vm472_vm7, %v470_v53  ;;  %v471_v55 = vmul.f32 0.04, %v465_v54 }
 0x17e   : > { %478 = vst.msk [vmem:[%s935_s30 + $0x28] sm:$0xff] %vm472_vm7, %v471_v55 }
 0x17f   : > { %675 = shalt.err (!%p672_p10)
}
 0x180   : > { %s676_s21 = scalar_lea.hbm %s962_s11, 768  ;;  %s680_s29 = scalar_lea.hbm %s1012_s1, 1536 }
 0x181   : > { %p677_p0 = scmp.ne.s32.totalorder %s962_s11, %s676_s21  ;;  %p681_p1 = scmp.lt.s32.totalorder %s962_s11, %s1012_s1 }
 0x182   : > { %p682_p3 = scmp.lt.s32.totalorder %s680_s29, %s676_s21 }
 0x183   : > { %p678_p2 = pnand %p677_p0, %p1020_p12 }
 0x184   : > { %p683_p6 = por %p682_p3, %p681_p1 }
 0x185   : > { %p679_p9 = pneg %p678_p2 }
 0x187   : > { %p684_p11 = pnand %p683_p6, %p679_p9 }
 0x189   : > { %687 = shalt.err (!%p684_p11)
}
 0x18a   : > { %s738_s25 = smov 128   ;;  %s739_s27 = smov 8  }
 0x18b   : > { %580 = dma.vmem_to_hbm [thread:$0]  (%p1020_p12), %s966_s3, 768, %s962_s11, %s480_s10, %s738_s25, %s738_s25, %s739_s27  }
 0x18c PF: > { %s508_s28 = sand.u32 1, %s714_s6   ;;  %p1021_p13 = scmp.ne.s32.totalorder %s1017_s18, 0 }
 0x18d   : > { %p1022_p4 = scmp.ge.s32.totalorder %s726_s9, 2  ;;  %s509_s30 = scalar_lea.sflag [#allocation5], %s508_s28 }
 0x18f   : > { %p587_p5 = pnand %p1022_p4, %p1021_p13 }
 0x191   : > { %p588_p7 = pneg %p587_p5 }
 0x193   : > { %709 = dma.done.wait (%p588_p7), %s509_s30, 768  }
 0x194   : > { %711 = vsyncadd (%p588_p7), %s509_s30, 4294966528  ;;  %p14_p8 = scmp.ge.s32.totalorder %s775_s12, 4   ;;  %s1023_s6 = smov %s718_s7 }
 0x195   : > { %s1024_s7 = smov %s722_s8  ;;  %s1025_s8 = smov %s787_s15 }
 0x196   : > { %s1026_s9 = smov %s775_s12  ;;  %16 = sbr.rel (!%p14_p8) target bundleno = 5 (0x5), region = 69 }
 0x19b   :  { %514 = vsyncpa [#allocation4], 1 }
 0x19c   :  { %516 = vsyncpa [#allocation4 + $0x1], 1 }
 0x19d   :  { %517 = vsyncpa [#allocation5], 1 }
 0x19e   :  { %519 = vsyncpa [#allocation5 + $0x1], 1 }

</bundles_post_ra>
